<compile_context>
chip_gen: v5e
topology: v5e:2x2
jax: 0.10.0
libtpu: 0.0.40
codegen_flags: <defaults>
</compile_context>

<pallas_src>
import functools
import math

import jax
import jax.numpy as jnp
from jax.experimental import pallas as pl
from jax.experimental.pallas import tpu as pltpu


def _attn_kernel(x_ref, v_ref, o_ref, *, use_mxu):
    # x_ref: (Bt, S, V)   v_ref: (1, V)   o_ref: (Bt, V)
    x = x_ref[...]                                   # native dtype (f32 or bf16)
    v_eff = v_ref[...].astype(jnp.float32)           # (1, V) folded dense@context

    # vu[b, s] = sum_v x[b, s, v] * v_eff[v]  (f32 accumulation; S on lane axis)
    vu = jnp.sum(x.astype(jnp.float32) * v_eff[None, :, :], axis=-1)   # (Bt, S)

    # Softmax over the sequence axis, f32 stats, EXACT divide (correctness fix:
    # approx reciprocal gave 3.6e-3 abs error; the divide is off the hot slot).
    m = jnp.max(vu, axis=-1, keepdims=True)                  # (Bt, 1)
    e = jnp.exp(vu - m)                                      # (Bt, S)
    score = e / jnp.sum(e, axis=-1, keepdims=True)           # (Bt, S)

    if use_mxu:
        # Production shapes: batched (Bt,1,S) x (Bt,S,V) contraction on the MXU,
        # f32 accumulation; x stays in its native dtype (bf16 friendly).
        out = jax.lax.dot_general(
            score[:, None, :].astype(x.dtype), x,
            dimension_numbers=(((2,), (1,)), ((0,), (0,))),
            preferred_element_type=jnp.float32,
        )[:, 0, :]                                           # (Bt, V)
    else:
        # Small shapes: broadcast-multiply + reduce on the VPU (f32).
        out = jnp.sum(x.astype(jnp.float32) * score[:, :, None], axis=1)  # (Bt, V)

    o_ref[...] = out.astype(o_ref.dtype)


def _pick_block_b(B, S, V, itemsize, *, target_bytes=2 << 20, max_block_bytes=8 << 20):
    """Batch rows per grid step: ~2 MiB of x per step, <= 8 MiB (v7x VMEM safe),
    and an exact divisor of B so no padding copy / partial block is needed."""
    row_bytes = max(1, S * V * itemsize)
    bt = max(1, min(B, target_bytes // row_bytes))
    bt = min(bt, max(1, max_block_bytes // row_bytes))
    bt = int(bt)
    while B % bt != 0:          # shrink to the largest divisor of B <= bt
        bt -= 1
    return bt


def dot_product_attention(x, weight, bias, context):
    """x: (B, S, V); weight: (A, V); bias: (A,); context: (A, 1) -> (B, V).

    Algebraically identical to the PyTorch module: dense weight and context fold
    into v_eff = W.T @ context; the bias contributes a per-row constant to vu
    that cancels under softmax (shift invariance).
    """
    B, S, V = x.shape

    # Fold the dense weight and context into one (1, V) lane-last vector.
    v_eff = jnp.dot(weight.T, context).reshape(1, V).astype(jnp.float32)

    bt = _pick_block_b(B, S, V, x.dtype.itemsize)
    grid = (B // bt,)
    use_mxu = (S >= 128) and (V >= 128)

    out = pl.pallas_call(
        functools.partial(_attn_kernel, use_mxu=use_mxu),
        out_shape=jax.ShapeDtypeStruct((B, V), x.dtype),
        grid_spec=pltpu.PrefetchScalarGridSpec(
            num_scalar_prefetch=0,
            grid=grid,
            in_specs=[
                # x: bt batch rows per step; S and V are full-extent so the
                # softmax never sees partial sequence positions.
                pl.BlockSpec((bt, S, V), lambda i: (i, 0, 0)),
                # folded dense@context vector, resident for the whole grid.
                pl.BlockSpec((1, V), lambda i: (0, 0)),
            ],
            out_specs=pl.BlockSpec((bt, V), lambda i: (i, 0)),
        ),
        compiler_params=pltpu.CompilerParams(
            # Batch axis is independent -> megacore shardable when grid > 1.
            dimension_semantics=("parallel",),
            # Blocks are capped at <= 8 MiB, so 2x double-buffered inputs + out
            # stay well under 32 MiB on every generation (incl. v7x's 64 MiB).
            vmem_limit_bytes=32 * 1024 * 1024,
        ),
    )(x, v_eff)
    return out


def init_params(key, value_size, attention_size):
    """Deterministic init matching the PyTorch module's __init__ shapes."""
    k_ctx, k_w, k_b = jax.random.split(key, 3)
    # xavier_uniform for context (attention_size, 1)
    bound_ctx = math.sqrt(6.0 / (attention_size + 1))
    context = jax.random.uniform(
        k_ctx, (attention_size, 1), jnp.float32, -bound_ctx, bound_ctx
    )
    # nn.Linear(value_size, attention_size): weight (A, V), bias (A,)
    bound_lin = 1.0 / math.sqrt(value_size)
    weight = jax.random.uniform(
        k_w, (attention_size, value_size), jnp.float32, -bound_lin, bound_lin
    )
    bias = jax.random.uniform(
        k_b, (attention_size,), jnp.float32, -bound_lin, bound_lin
    )
    return weight, bias, context


def reference(x, weight, bias, context):
    # Unfused reference: exactly the PyTorch forward (validates the algebraic fold).
    t = jnp.einsum("bsv,av->bsa", x, weight) + bias
    vu = jnp.einsum("bsa,ao->bs", t, context)
    score = jax.nn.softmax(vu, axis=-1)
    return jnp.sum(x * score[..., None], axis=-2)


if __name__ == "__main__":
    B, S, V, A = 16, 8, 32, 16
    key = jax.random.PRNGKey(0)
    k_x, k_p = jax.random.split(key)
    x = jax.random.normal(k_x, (B, S, V), jnp.float32)
    weight, bias, context = init_params(k_p, V, A)

    out = dot_product_attention(x, weight, bias, context)
    out = jax.block_until_ready(out)

    ref = reference(x, weight, bias, context)
    assert out.shape == (B, V), out.shape
    err = float(jnp.max(jnp.abs(out - ref)))
    assert jnp.allclose(out, ref, atol=1e-4, rtol=1e-4), f"max abs err {err}"
    print("KERNEL_OK")
</pallas_src>

<mosaic_0001>
module attributes {stable_mosaic.version = 11 : i64} {
  func.func @_attn_kernel(%arg0: i32, %arg1: memref<16x8x32xf32, #tpu.memory_space<vmem>>, %arg2: memref<1x32xf32, #tpu.memory_space<vmem>>, %arg3: memref<16x32xf32, #tpu.memory_space<vmem>>) attributes {dimension_semantics = [#tpu.dimension_semantics<parallel>], iteration_bounds = array<i64: 1>, scalar_prefetch = 0 : i64, scratch_operands = 0 : i64, tpu.core_type = #tpu.core_type<tc>, window_params = [{transform_indices = @transform_0, window_bounds = array<i64: 16, 8, 32>}, {pipeline_mode = #tpu.pipeline_mode<synchronous>, transform_indices = @transform_1, window_bounds = array<i64: 1, 32>}, {transform_indices = @transform_2, window_bounds = array<i64: 16, 32>}]} {
    %c0 = arith.constant 0 : index
    %c0_0 = arith.constant 0 : index
    %c0_1 = arith.constant 0 : index
    %0 = vector.load %arg1[%c0, %c0_0, %c0_1] : memref<16x8x32xf32, #tpu.memory_space<vmem>>, vector<16x8x32xf32>
    %c0_2 = arith.constant 0 : index
    %c0_3 = arith.constant 0 : index
    %1 = vector.load %arg2[%c0_2, %c0_3] : memref<1x32xf32, #tpu.memory_space<vmem>>, vector<1x32xf32>
    %2 = vector.shape_cast %1 : vector<1x32xf32> to vector<1x1x32xf32>
    %3 = vector.broadcast %2 : vector<1x1x32xf32> to vector<16x8x32xf32>
    %4 = arith.mulf %0, %3 : vector<16x8x32xf32>
    %cst = arith.constant dense<0.000000e+00> : vector<16x8xf32>
    %5 = vector.multi_reduction <add>, %4, %cst [2] : vector<16x8x32xf32> to vector<16x8xf32>
    %cst_4 = arith.constant dense<0xFF800000> : vector<16xf32>
    %6 = vector.multi_reduction <maximumf>, %5, %cst_4 [1] : vector<16x8xf32> to vector<16xf32>
    %7 = vector.shape_cast %6 : vector<16xf32> to vector<16x1xf32>
    %8 = vector.broadcast %7 : vector<16x1xf32> to vector<16x8xf32>
    %9 = arith.subf %5, %8 : vector<16x8xf32>
    %10 = math.exp %9 : vector<16x8xf32>
    %cst_5 = arith.constant dense<0.000000e+00> : vector<16xf32>
    %11 = vector.multi_reduction <add>, %10, %cst_5 [1] : vector<16x8xf32> to vector<16xf32>
    %12 = vector.shape_cast %11 : vector<16xf32> to vector<16x1xf32>
    %13 = vector.broadcast %12 : vector<16x1xf32> to vector<16x8xf32>
    %14 = arith.divf %10, %13 : vector<16x8xf32>
    %15 = vector.shape_cast %14 : vector<16x8xf32> to vector<16x8x1xf32>
    %16 = vector.broadcast %15 : vector<16x8x1xf32> to vector<16x8x32xf32>
    %17 = arith.mulf %0, %16 : vector<16x8x32xf32>
    %cst_6 = arith.constant dense<0.000000e+00> : vector<16x32xf32>
    %18 = vector.multi_reduction <add>, %17, %cst_6 [1] : vector<16x8x32xf32> to vector<16x32xf32>
    %c0_7 = arith.constant 0 : index
    %c0_8 = arith.constant 0 : index
    %19 = vector.load %arg3[%c0_7, %c0_8] : memref<16x32xf32, #tpu.memory_space<vmem>>, vector<16x32xf32>
    tpu.vector_store %arg3[%c0_7, %c0_8], %18 {strides = array<i32>} : memref<16x32xf32, #tpu.memory_space<vmem>>, vector<16x32xf32>,
    return
  }
  func.func @transform_0(%arg0: i32) -> (i32, i32, i32) {
    %c0_i32 = arith.constant 0 : i32
    %c0_i32_0 = arith.constant 0 : i32
    %c0_i32_1 = arith.constant 0 : i32
    return %arg0, %c0_i32, %c0_i32_0 : i32, i32, i32
  }
  func.func @transform_1(%arg0: i32) -> (i32, i32) {
    %c0_i32 = arith.constant 0 : i32
    %c0_i32_0 = arith.constant 0 : i32
    %c0_i32_1 = arith.constant 0 : i32
    return %c0_i32, %c0_i32_0 : i32, i32
  }
  func.func @transform_2(%arg0: i32) -> (i32, i32) {
    %c0_i32 = arith.constant 0 : i32
    %c0_i32_0 = arith.constant 0 : i32
    return %arg0, %c0_i32 : i32, i32
  }
}

</mosaic_0001>

<bundles_post_ra>
// kernel: tpu_custom_call.1
= control target key start
LH: loop header
LB: loop body
LE: loop exit
PB: predicated region body
PF: predicated region fallthrough
CT: control target
= control target key end

     0   :  { %7 = vsyncpa [#allocation3], 0  ;;  %s1682_s0 = inlined_call_operand.hbm [shape: f32[16,8,32], index: 0, kind: input, shape index: {}]   ;;  %s1683_s1 = inlined_call_operand.hbm [shape: f32[1,32], index: 1, kind: input, shape index: {}]   ;;  %s1684_s2 = inlined_call_operand.hbm [shape: f32[16,32], index: 2, kind: output, shape index: {}]  }
   0x1   :  { %8 = vsyncpa [#allocation6], 0 }
   0x2   :  { %9 = vsyncpa [#allocation4], 0  ;;  %s14_s11 = sshll.u32 %s1682_s0, 4  ;;  %s1079_s12 = smov [#allocation2]   ;;  %s15_s11 = int_to_ptr.hbm [resolvable:$true] %s14_s11 }
   0x3   :  { %s16_s13 = sshll.u32 %s1079_s12, 4  ;;  %s28_s16 = sshll.u32 %s1683_s1, 4  ;;  %s17_s13 = int_to_ptr.vmem [resolvable:$true] %s16_s13  ;;  %s29_s16 = int_to_ptr.hbm [resolvable:$true] %s28_s16 }
   0x4   :  { %s1080_s17 = smov 128   ;;  %s1081_s18 = smov 8  }
   0x5   :  { %22 = dma.hbm_to_vmem [thread:$0]  %s15_s11, 2048, %s17_s13, [#allocation3], %s1080_s17, %s1080_s17, %s1081_s18  }
   0x6   :  { %s1082_s19 = smov [#allocation5]  }
   0x7   :  { %s30_s20 = sshll.u32 %s1082_s19, 4  ;;  %s31_s20 = int_to_ptr.vmem [resolvable:$true] %s30_s20 }
   0x8   :  { %33 = dma.hbm_to_vmem [thread:$0]  %s29_s16, 16, %s31_s20, [#allocation6]  }
   0x9   :  { %1073 = dma.done.wait [#allocation3], 2048  }
   0xa   :  { %1074 = vsyncadd [#allocation3], 4294965248 }
   0xb   :  { %1075 = dma.done.wait [#allocation6], 16  }
   0xc   :  { %1076 = vsyncadd [#allocation6], 4294967280  ;;  %v50_v0 = vld [vmem:[#allocation2 + $0x40] sm:$0xff]  ;;  %vm78_vm0 = vcmask 261120   ;;  %v44_v3 = vld [vmem:[#allocation2 + $0x10] sm:$0xff]  ;;  %v143_v55 = vlaneseq  ;;  %vm161_vm1 = vcmask 1041409  }
   0xd   :  { %v920_v1 = vld [vmem:[#allocation5] ss:$0 sm:$0xff]  ;;  %v51_v7 = vld [vmem:[#allocation2 + $0x48] sm:$0xff]  ;;  %v52_v12 = vld [vmem:[#allocation2 + $0x50] sm:$0xff]  ;;  %vm163_vm2 = vcmask 1042434   ;;  %vm165_vm3 = vcmask 1043459  }
   0xe   :  { %v42_v2 = vld [vmem:[#allocation2] sm:$0xff]  ;;  %v70_v4 = vmul.f32 %v920_v1, %v50_v0  ;;  %v64_v6 = vmul.f32 %v920_v1, %v44_v3  ;;  %v43_v8 = vld [vmem:[#allocation2 + $0x8] sm:$0xff]  ;;  %v71_v13 = vmul.f32 %v920_v1, %v51_v7  ;;  %v72_v15 = vmul.f32 %v920_v1, %v52_v12  ;;  %v53_v19 = vld [vmem:[#allocation2 + $0x58] sm:$0xff]  ;;  %s1084_s0 = smov [#allocation7]   ;;  %s897_s23 = sshll.u32 %s1684_s2, 4  ;;  %s898_s23 = int_to_ptr.hbm [resolvable:$true] %s897_s23 }
   0xf   :  { %v62_v5 = vmul.f32 %v920_v1, %v42_v2  ;;  %v63_v14 = vmul.f32 %v920_v1, %v43_v8  ;;  %v45_v20 = vld [vmem:[#allocation2 + $0x18] sm:$0xff]  ;;  %v46_v21 = vld [vmem:[#allocation2 + $0x20] sm:$0xff]  ;;  %v73_v22 = vmul.f32 %v920_v1, %v53_v19  ;;  %v47_v28 = vld [vmem:[#allocation2 + $0x28] sm:$0xff]  ;;  %v1143_v59 = vand.u32 127, %v143_v55  ;;  %s895_s1 = sshll.u32 %s1084_s0, 4  ;;  %s896_s1 = int_to_ptr.vmem [resolvable:$true] %s895_s1 }
  0x10   :  { %v103_v9 = vsel %vm78_vm0, %v70_v4, 0.0  ;;  %v85_v11 = vsel %vm78_vm0, %v64_v6, 0.0  ;;  %v106_v16 = vsel %vm78_vm0, %v71_v13, 0.0  ;;  %v109_v18 = vsel %vm78_vm0, %v72_v15, 0.0  ;;  %v54_v29 = vld [vmem:[#allocation2 + $0x60] sm:$0xff]  ;;  %v55_v30 = vld [vmem:[#allocation2 + $0x68] sm:$0xff] }
  0x11   :  { %v79_v10 = vsel %vm78_vm0, %v62_v5, 0.0  ;;  %104 = vadd.xlane.f32.xlu1 %v103_v9  ;;  %86 = vadd.xlane.f32.xlu2 %v85_v11  ;;  %v82_v17 = vsel %vm78_vm0, %v63_v14, 0.0  ;;  %v65_v23 = vmul.f32 %v920_v1, %v45_v20  ;;  %v66_v24 = vmul.f32 %v920_v1, %v46_v21  ;;  %v56_v37 = vld [vmem:[#allocation2 + $0x70] sm:$0xff]  ;;  %v49_v39 = vld [vmem:[#allocation2 + $0x38] sm:$0xff] }
  0x12   :  { %80 = vadd.xlane.f32.xlu0 %v79_v10  ;;  %v112_v25 = vsel %vm78_vm0, %v73_v22, 0.0  ;;  %v67_v31 = vmul.f32 %v920_v1, %v47_v28  ;;  %v74_v32 = vmul.f32 %v920_v1, %v54_v29  ;;  %v75_v33 = vmul.f32 %v920_v1, %v55_v30  ;;  %v48_v38 = vld [vmem:[#allocation2 + $0x30] sm:$0xff]  ;;  %v57_v46 = vld [vmem:[#allocation2 + $0x78] sm:$0xff] }
  0x13   :  { %v88_v26 = vsel %vm78_vm0, %v65_v23, 0.0  ;;  %v91_v27 = vsel %vm78_vm0, %v66_v24, 0.0  ;;  %v76_v40 = vmul.f32 %v920_v1, %v56_v37  ;;  %v68_v41 = vmul.f32 %v920_v1, %v48_v38 }
  0x14   :  { %v94_v34 = vsel %vm78_vm0, %v67_v31, 0.0  ;;  %v115_v35 = vsel %vm78_vm0, %v74_v32, 0.0  ;;  %v118_v36 = vsel %vm78_vm0, %v75_v33, 0.0  ;;  %v69_v42 = vmul.f32 %v920_v1, %v49_v39 }
  0x15   :  { %v121_v43 = vsel %vm78_vm0, %v76_v40, 0.0  ;;  %v97_v44 = vsel %vm78_vm0, %v68_v41, 0.0  ;;  %v77_v47 = vmul.f32 %v920_v1, %v57_v46  ;;  %vm1688_vm4 = vcmask 1044484  }
  0x16   :  { %v100_v45 = vsel %vm78_vm0, %v69_v42, 0.0  ;;  %vm1687_vm5 = vcmask 1045509   ;;  %vm1686_vm6 = vcmask 1046534   ;;  %vm1685_vm7 = vcmask 1047559  }
  0x17   :  { %v124_v48 = vsel %vm78_vm0, %v77_v47, 0.0  ;;  %vm184_vm8 = vcmask 64512  }
  0x19   :  { %107 = vadd.xlane.f32.xlu1 %v106_v16  ;;  %110 = vadd.xlane.f32.xlu2 %v109_v18 }
  0x1a   :  { %83 = vadd.xlane.f32.xlu0 %v82_v17 }
  0x21   :  { %113 = vadd.xlane.f32.xlu1 %v112_v25  ;;  %92 = vadd.xlane.f32.xlu2 %v91_v27 }
  0x22   :  { %89 = vadd.xlane.f32.xlu0 %v88_v26 }
  0x29   :  { %95 = vadd.xlane.f32.xlu1 %v94_v34  ;;  %119 = vadd.xlane.f32.xlu2 %v118_v36 }
  0x2a   :  { %116 = vadd.xlane.f32.xlu0 %v115_v35  ;;  %v1083_v35 = vmov 0  }
  0x2b   :  { %919 = vset.pattern.permute.xlu2 %v1083_v35  ;;  %918 = vset.pattern.permute.xlu1 %v1083_v35 }
  0x2c   :  { %917 = vset.pattern.permute.xlu0 %v1083_v35 }
  0x31   :  { %122 = vadd.xlane.f32.xlu1 %v121_v43  ;;  %101 = vadd.xlane.f32.xlu2 %v100_v45 }
  0x32   :  { %98 = vadd.xlane.f32.xlu0 %v97_v44 }
  0x3a   :  { %125 = vadd.xlane.f32.xlu0 %v124_v48 }
  0x84   :  { %v1125_v49 = vpop.xlane.xlu1 %104  ;;  %v1129_v51 = vpop.xlane.xlu2 %86 }
  0x85   :  { %v1127_v50 = vpop.xlane.xlu0 %80  ;;  %v147_v3 = vperm.slane %v1129_v51, %v1143_v59  ;;  %v153_v4 = vperm.slane %v1125_v49, %v1143_v59 }
  0x86   :  { %v145_v61 = vperm.slane %v1127_v50, %v1143_v59 }
  0x8c   :  { %v1131_v52 = vpop.xlane.xlu1 %107  ;;  %v1135_v54 = vpop.xlane.xlu2 %110 }
  0x8d   :  { %v1133_v53 = vpop.xlane.xlu0 %83  ;;  %v154_v5 = vperm.slane %v1131_v52, %v1143_v59  ;;  %v155_v10 = vperm.slane %v1135_v54, %v1143_v59 }
  0x8e   :  { %v146_v60 = vperm.slane %v1133_v53, %v1143_v59 }
  0x8f   :  { %v175_v12 = vsel %vm161_vm1, %v154_v5, %v153_v4 }
  0x90   :  { %v162_v1 = vsel %vm161_vm1, %v146_v60, %v145_v61  ;;  %v176_v22 = vsel %vm163_vm2, %v155_v10, %v175_v12 }
  0x91   :  { %v164_v6 = vsel %vm163_vm2, %v147_v3, %v162_v1 }
  0x94   :  { %v1137_v56 = vpop.xlane.xlu1 %113  ;;  %v1141_v58 = vpop.xlane.xlu2 %92 }
  0x95   :  { %v1139_v57 = vpop.xlane.xlu0 %89  ;;  %v149_v7 = vperm.slane %v1141_v58, %v1143_v59  ;;  %v156_v13 = vperm.slane %v1137_v56, %v1143_v59 }
  0x96   :  { %v148_v2 = vperm.slane %v1139_v57, %v1143_v59 }
  0x97   :  { %v177_v24 = vsel %vm165_vm3, %v156_v13, %v176_v22 }
  0x98   :  { %v166_v8 = vsel %vm165_vm3, %v148_v2, %v164_v6 }
  0x99   :  { %v168_v14 = vsel %vm1688_vm4, %v149_v7, %v166_v8 }
  0x9c   :  { %v1151_v63 = vpop.xlane.xlu1 %95  ;;  %v1153_v0 = vpop.xlane.xlu2 %119 }
  0x9d   :  { %v1149_v62 = vpop.xlane.xlu0 %116  ;;  %v150_v9 = vperm.slane %v1151_v63, %v1143_v59  ;;  %v158_v25 = vperm.slane %v1153_v0, %v1143_v59 }
  0x9e   :  { %v157_v17 = vperm.slane %v1149_v62, %v1143_v59 }
  0x9f   :  { %v170_v19 = vsel %vm1687_vm5, %v150_v9, %v168_v14 }
  0xa0   :  { %v178_v27 = vsel %vm1688_vm4, %v157_v17, %v177_v24 }
  0xa1   :  { %v179_v31 = vsel %vm1687_vm5, %v158_v25, %v178_v27 }
  0xa4   :  { %v102_v16 = vpop.xlane.xlu2 %101  ;;  %v1184_v20 = vpop.xlane.xlu1 %122 }
  0xa5   :  { %v1172_v11 = vpop.xlane.xlu0 %98  ;;  %v152_v18 = vperm.slane %v102_v16, %v1143_v59  ;;  %v159_v28 = vperm.slane %v1184_v20, %v1143_v59 }
  0xa6   :  { %v151_v15 = vperm.slane %v1172_v11, %v1143_v59 }
  0xa7   :  { %v180_v32 = vsel %vm1686_vm6, %v159_v28, %v179_v31 }
  0xa8   :  { %v172_v21 = vsel %vm1686_vm6, %v151_v15, %v170_v19 }
  0xa9   :  { %v174_v23 = vsel %vm1685_vm7, %v152_v18, %v172_v21 }
  0xaa   :  { %v185_v26 = vsel %vm184_vm8, %v174_v23, -inf }
  0xab   :  { %186 = vmax.xlane.f32.xlu1 %v185_v26 }
  0xad   :  { %v1196_v29 = vpop.xlane.xlu0 %125 }
  0xae   :  { %v160_v30 = vperm.slane %v1196_v29, %v1143_v59 }
  0xb0   :  { %v181_v33 = vsel %vm1685_vm7, %v160_v30, %v180_v32 }
  0xb1   :  { %v188_v34 = vsel %vm184_vm8, %v181_v33, -inf }
  0xb2   :  { %189 = vmax.xlane.f32.xlu2 %v188_v34 }
 0x11e   :  { %v187_v36 = vpop.xlane.xlu1 %186 }
 0x11f   :  { %v194_v37 = vperm.slane %v187_v36, 1  ;;  %v193_v38 = vperm.slane %v187_v36, 0  ;;  %v195_v39 = vperm.slane %v187_v36, 2  ;;  %v197_v43 = vperm.slane %v187_v36, 4 }
 0x120   :  { %v200_v44 = vperm.slane %v187_v36, 7  ;;  %v196_v45 = vperm.slane %v187_v36, 3  ;;  %v198_v5 = vperm.slane %v187_v36, 5 }
 0x121   :  { %v226_v40 = vsub.f32 %v1133_v53, %v194_v37  ;;  %v225_v41 = vsub.f32 %v1127_v50, %v193_v38  ;;  %v227_v42 = vsub.f32 %v1129_v51, %v195_v39  ;;  %v229_v55 = vsub.f32 %v1141_v58, %v197_v43 }
 0x122   :  { %v232_v60 = vsub.f32 %v102_v16, %v200_v44  ;;  %v228_v53 = vsub.f32 %v1139_v57, %v196_v45  ;;  %v199_v50 = vperm.slane %v187_v36, 6  ;;  %v230_v8 = vsub.f32 %v1151_v63, %v198_v5 }
 0x123   :  { %v243_v46 = vmul.f32 1.442695, %v226_v40  ;;  %v241_v47 = vmul.f32 1.442695, %v225_v41  ;;  %v245_v48 = vmul.f32 1.442695, %v227_v42 }
 0x124   :  { %v249_v1 = vmul.f32 1.442695, %v229_v55  ;;  %v255_v2 = vmul.f32 1.442695, %v232_v60  ;;  %v247_v4 = vmul.f32 1.442695, %v228_v53  ;;  %v231_v57 = vsub.f32 %v1172_v11, %v199_v50 }
 0x125   :  { %921 = vpow2.f32 %v243_v46  ;;  %v1208_v61 = vpop.xlane.xlu2 %189  ;;  %v251_v15 = vmul.f32 1.442695, %v230_v8 }
 0x126   :  { %923 = vpow2.f32 %v241_v47  ;;  %v203_v51 = vperm.slane %v1208_v61, 2  ;;  %v253_v9 = vmul.f32 1.442695, %v231_v57  ;;  %v202_v10 = vperm.slane %v1208_v61, 1 }
 0x127   :  { %925 = vpow2.f32 %v245_v48  ;;  %v206_v13 = vperm.slane %v1208_v61, 5  ;;  %v201_v16 = vperm.slane %v1208_v61, 0  ;;  %v205_v21 = vperm.slane %v1208_v61, 4 }
 0x128   :  { %927 = vpow2.f32 %v249_v1  ;;  %v235_v7 = vsub.f32 %v1135_v54, %v203_v51  ;;  %v234_v54 = vsub.f32 %v1131_v52, %v202_v10  ;;  %v204_v25 = vperm.slane %v1208_v61, 3 }
 0x129   :  { %929 = vpow2.f32 %v255_v2  ;;  %v238_v63 = vsub.f32 %v1153_v0, %v206_v13  ;;  %v233_v18 = vsub.f32 %v1125_v49, %v201_v16  ;;  %v237_v49 = vsub.f32 %v1149_v62, %v205_v21 }
 0x12a   :  { %931 = vpow2.f32 %v247_v4  ;;  %v261_v12 = vmul.f32 1.442695, %v235_v7  ;;  %v259_v19 = vmul.f32 1.442695, %v234_v54  ;;  %v236_v0 = vsub.f32 %v1137_v56, %v204_v25 }
 0x12b   :  { %v1212_v3 = vpop.eup %921  ;;  %933 = vpow2.f32 %v253_v9  ;;  %v267_v22 = vmul.f32 1.442695, %v238_v63  ;;  %v257_v24 = vmul.f32 1.442695, %v233_v18  ;;  %v265_v27 = vmul.f32 1.442695, %v237_v49 }
 0x12c   :  { %v1214_v6 = vpop.eup %923  ;;  %293 = vperm.xlu1 %918, %v1212_v3   ;;  %935 = vpow2.f32 %v261_v12  ;;  %v208_v28 = vperm.slane %v1208_v61, 7  ;;  %v263_v31 = vmul.f32 1.442695, %v236_v0  ;;  %v207_v32 = vperm.slane %v1208_v61, 6 }
 0x12d   :  { %v1217_v58 = vpop.eup %925  ;;  %290 = vperm.xlu0 %917, %v1214_v6   ;;  %937 = vpow2.f32 %v251_v15 }
 0x12e   :  { %296 = vperm.xlu2 %919, %v1217_v58   ;;  %v1226_v14 = vpop.eup %927  ;;  %939 = vpow2.f32 %v259_v19  ;;  %v240_v62 = vsub.f32 %v1196_v29, %v208_v28  ;;  %v239_v56 = vsub.f32 %v1184_v20, %v207_v32 }
 0x12f   :  { %v1229_v11 = vpop.eup %929  ;;  %941 = vpow2.f32 %v267_v22 }
 0x130   :  { %v1232_v17 = vpop.eup %931  ;;  %943 = vpow2.f32 %v257_v24  ;;  %v271_v35 = vmul.f32 1.442695, %v240_v62  ;;  %v269_v37 = vmul.f32 1.442695, %v239_v56 }
 0x131   :  { %v1240_v23 = vpop.eup %933  ;;  %945 = vpow2.f32 %v265_v27 }
 0x132   :  { %v1243_v26 = vpop.eup %935  ;;  %947 = vpow2.f32 %v263_v31 }
 0x133   :  { %v1246_v52 = vpop.eup %937  ;;  %949 = vpow2.f32 %v271_v35 }
 0x134   :  { %302 = vperm.xlu1 %918, %v1226_v14   ;;  %v1253_v30 = vpop.eup %939  ;;  %951 = vpow2.f32 %v269_v37 }
 0x135   :  { %311 = vperm.xlu0 %917, %v1229_v11   ;;  %v1256_v33 = vpop.eup %941 }
 0x136   :  { %299 = vperm.xlu2 %919, %v1232_v17   ;;  %v1259_v34 = vpop.eup %943 }
 0x137   :  { %v1265_v36 = vpop.eup %945 }
 0x138   :  { %v1268_v38 = vpop.eup %947 }
 0x139   :  { %v1271_v39 = vpop.eup %949 }
 0x13a   :  { %v1274_v29 = vpop.eup %951 }
 0x13c   :  { %308 = vperm.xlu1 %918, %v1240_v23  }
 0x13d   :  { %320 = vperm.xlu0 %917, %v1243_v26  }
 0x13e   :  { %305 = vperm.xlu2 %919, %v1246_v52  }
 0x144   :  { %317 = vperm.xlu1 %918, %v1253_v30  }
 0x145   :  { %329 = vperm.xlu0 %917, %v1256_v33  }
 0x146   :  { %314 = vperm.xlu2 %919, %v1259_v34  }
 0x14c   :  { %326 = vperm.xlu1 %918, %v1265_v36  }
 0x14e   :  { %323 = vperm.xlu2 %919, %v1268_v38  }
 0x154   :  { %335 = vperm.xlu1 %918, %v1271_v39  }
 0x156   :  { %332 = vperm.xlu2 %919, %v1274_v29  }
 0x188   :  { %v297_v20 = vpop.permute.xlu2 %296 }
 0x189   :  { %v339_v48 = vperm.slane %v297_v20, %v1143_v59 }
 0x190   :  { %v300_v40 = vpop.permute.xlu2 %299 }
 0x191   :  { %v340_v61 = vperm.slane %v300_v40, %v1143_v59 }
 0x198   :  { %v306_v45 = vpop.permute.xlu2 %305 }
 0x199   :  { %v342_v2 = vperm.slane %v306_v45, %v1143_v59 }
 0x19e   :  { %v294_v41 = vpop.permute.xlu1 %293 }
 0x19f   :  { %v291_v42 = vpop.permute.xlu0 %290  ;;  %v338_v43 = vperm.slane %v294_v41, %v1143_v59 }
 0x1a0   :  { %v337_v44 = vperm.slane %v291_v42, %v1143_v59  ;;  %v315_v4 = vpop.permute.xlu2 %314 }
 0x1a1   :  { %v345_v16 = vperm.slane %v315_v4, %v1143_v59 }
 0x1a2   :  { %v353_v46 = vsel %vm161_vm1, %v338_v43, %v337_v44 }
 0x1a3   :  { %v354_v55 = vsel %vm163_vm2, %v339_v48, %v353_v46 }
 0x1a4   :  { %v355_v53 = vsel %vm165_vm3, %v340_v61, %v354_v55 }
 0x1a6   :  { %v303_v47 = vpop.permute.xlu1 %302 }
 0x1a7   :  { %v341_v60 = vperm.slane %v303_v47, %v1143_v59  ;;  %v312_v1 = vpop.permute.xlu0 %311 }
 0x1a8   :  { %v344_v57 = vperm.slane %v312_v1, %v1143_v59  ;;  %v324_v54 = vpop.permute.xlu2 %323 }
 0x1a9   :  { %v356_v50 = vsel %vm1688_vm4, %v341_v60, %v355_v53  ;;  %v348_v22 = vperm.slane %v324_v54, %v1143_v59 }
 0x1aa   :  { %v357_v7 = vsel %vm1687_vm5, %v342_v2, %v356_v50 }
 0x1ae   :  { %v309_v51 = vpop.permute.xlu1 %308 }
 0x1af   :  { %v343_v5 = vperm.slane %v309_v51, %v1143_v59  ;;  %v321_v12 = vpop.permute.xlu0 %320 }
 0x1b0   :  { %v347_v18 = vperm.slane %v321_v12, %v1143_v59  ;;  %v333_v27 = vpop.permute.xlu2 %332 }
 0x1b1   :  { %v358_v8 = vsel %vm1686_vm6, %v343_v5, %v357_v7  ;;  %v351_v32 = vperm.slane %v333_v27, %v1143_v59 }
 0x1b2   :  { %v359_v9 = vsel %vm1685_vm7, %v344_v57, %v358_v8 }
 0x1b3   :  { %v369_v10 = vsel %vm184_vm8, %v359_v9, 0.0 }
 0x1b4   :  { %370 = vadd.xlane.f32.xlu0 %v369_v10 }
 0x1b6   :  { %v318_v13 = vpop.permute.xlu1 %317 }
 0x1b7   :  { %v346_v15 = vperm.slane %v318_v13, %v1143_v59  ;;  %v330_v25 = vpop.permute.xlu0 %329 }
 0x1b8   :  { %v350_v28 = vperm.slane %v330_v25, %v1143_v59 }
 0x1b9   :  { %v360_v63 = vsel %vm161_vm1, %v346_v15, %v345_v16 }
 0x1ba   :  { %v361_v19 = vsel %vm163_vm2, %v347_v18, %v360_v63 }
 0x1bb   :  { %v362_v49 = vsel %vm165_vm3, %v348_v22, %v361_v19 }
 0x1be   :  { %v327_v21 = vpop.permute.xlu1 %326 }
 0x1bf   :  { %v349_v24 = vperm.slane %v327_v21, %v1143_v59 }
 0x1c1   :  { %v363_v0 = vsel %vm1688_vm4, %v349_v24, %v362_v49 }
 0x1c2   :  { %v364_v31 = vsel %vm1687_vm5, %v350_v28, %v363_v0 }
 0x1c3   :  { %v365_v35 = vsel %vm1686_vm6, %v351_v32, %v364_v31 }
 0x1c6   :  { %v336_v62 = vpop.permute.xlu1 %335 }
 0x1c7   :  { %v352_v56 = vperm.slane %v336_v62, %v1143_v59 }
 0x1c9   :  { %v366_v37 = vsel %vm1685_vm7, %v352_v56, %v365_v35 }
 0x1ca   :  { %v372_v20 = vsel %vm184_vm8, %v366_v37, 0.0 }
 0x1cb   :  { %373 = vadd.xlane.f32.xlu2 %v372_v20 }
 0x227   :  { %v1309_v40 = vpop.xlane.xlu0 %370 }
 0x228   :  { %v377_v41 = vperm.slane %v1309_v40, 0  ;;  %v378_v42 = vperm.slane %v1309_v40, 1  ;;  %v1314_v43 = vperm.slane %v1309_v40, 2  ;;  %v1317_v44 = vperm.slane %v1309_v40, 3 }
 0x229   :  { %v1321_v59 = vperm.slane %v1309_v40, 4  ;;  %v1325_v45 = vperm.slane %v1309_v40, 6  ;;  %v1343_v19 = vperm.slane %v1309_v40, 5 }
 0x22a   :  { %953 = vrcp.f32 %v377_v41  ;;  %v418_v50 = vand.u32 2147483647, %v377_v41  ;;  %v420_v2 = vand.u32 2147483648, %v377_v41  ;;  %vm414_vm10 = vweird.f32 %v377_v41 }
 0x22b   :  { %955 = vrcp.f32 %v378_v42  ;;  %v433_v15 = vand.u32 2147483647, %v378_v42  ;;  %v435_v16 = vand.u32 2147483648, %v378_v42  ;;  %vm429_vm14 = vweird.f32 %v378_v42 }
 0x22c   :  { %957 = vrcp.f32 %v1314_v43  ;;  %vm419_vm12 = vcmp.eq.f32.partialorder %v418_v50, 8.507059e+37  ;;  %v421_v13 = vor.u32 1.1754944e-38, %v420_v2  ;;  %vm444_vm15 = vweird.f32 %v1314_v43 }
 0x22d   :  { %959 = vrcp.f32 %v1317_v44  ;;  %v436_v28 = vor.u32 1.1754944e-38, %v435_v16  ;;  %v448_v31 = vand.u32 2147483647, %v1314_v43  ;;  %v463_v35 = vand.u32 2147483647, %v1317_v44 }
 0x22e   :  { %961 = vrcp.f32 %v1321_v59  ;;  %v510_v2 = vand.u32 2147483648, %v1325_v45 }
 0x22f   :  { %963 = vrcp.f32 %v1325_v45 }
 0x230   :  { %v954_v46 = vpop.eup %953  ;;  %965 = vrcp.f32 %v1343_v19 }
 0x231   :  { %v956_v47 = vpop.eup %955  ;;  %v410_v48 = vmul.f32 %v954_v46, %v377_v41  ;;  %vm415_vm9 = vweird.f32 %v954_v46 }
 0x232   :  { %v1328_v55 = vpop.eup %957  ;;  %v425_v60 = vmul.f32 %v956_v47, %v378_v42  ;;  %vm416_vm11 = vmor %vm414_vm10, %vm415_vm9  ;;  %vm430_vm13 = vweird.f32 %v956_v47  ;;  %vm1356_vm9 = vcmp.eq.f32.partialorder %v433_v15, 8.507059e+37 }
 0x233   :  { %v1331_v61 = vpop.eup %959  ;;  %v411_v53 = vsub.f32 1.0, %v410_v48  ;;  %v440_v1 = vmul.f32 %v1328_v55, %v1314_v43  ;;  %vm1352_vm8 = vmor %vm429_vm14, %vm430_vm13  ;;  %vm445_vm10 = vweird.f32 %v1328_v55  ;;  %vm1387_vm14 = vcmp.eq.f32.partialorder %v448_v31, 8.507059e+37 }
 0x234   :  { %v426_v51 = vsub.f32 1.0, %v425_v60  ;;  %v455_v4 = vmul.f32 %v1331_v61, %v1317_v44  ;;  %v1337_v8 = vpop.eup %961  ;;  %vm1383_vm13 = vmor %vm444_vm15, %vm445_vm10  ;;  %vm474_vm10 = vweird.f32 %v1321_v59 }
 0x235   :  { %v412_v5 = vmul.f32 %v954_v46, %v411_v53  ;;  %v441_v57 = vsub.f32 1.0, %v440_v1  ;;  %v1339_v12 = vpop.eup %963  ;;  %v470_v22 = vmul.f32 %v1337_v8, %v1321_v59  ;;  %v465_v1 = vand.u32 2147483648, %v1317_v44 }
 0x236   :  { %v427_v7 = vmul.f32 %v956_v47, %v426_v51  ;;  %v456_v10 = vsub.f32 1.0, %v455_v4  ;;  %v500_v49 = vmul.f32 %v1339_v12, %v1325_v45 }
 0x237   :  { %v413_v9 = vadd.f32 %v954_v46, %v412_v5  ;;  %v442_v18 = vmul.f32 %v1328_v55, %v441_v57  ;;  %v471_v37 = vsub.f32 1.0, %v470_v22  ;;  %v466_v16 = vor.u32 1.1754944e-38, %v465_v1 }
 0x238   :  { %v428_v63 = vadd.f32 %v956_v47, %v427_v7  ;;  %v457_v25 = vmul.f32 %v1331_v61, %v456_v10  ;;  %v1423_v10 = vpop.eup %965 }
 0x239   :  { %v417_v54 = vsel %vm416_vm11, %v954_v46, %v413_v9  ;;  %v443_v62 = vadd.f32 %v1328_v55, %v442_v18  ;;  %vm459_vm11 = vweird.f32 %v1317_v44  ;;  %v501_v46 = vsub.f32 1.0, %v500_v49 }
 0x23a   :  { %v422_v21 = vsel %vm419_vm12, %v421_v13, %v417_v54  ;;  %v432_v32 = vsel %vm1352_vm8, %v956_v47, %v428_v63  ;;  %vm460_vm12 = vweird.f32 %v1331_v61  ;;  %v458_v42 = vadd.f32 %v1331_v61, %v457_v25 }
 0x23b   :  { %v423_v24 = vmul.f32 %v1214_v6, %v422_v21  ;;  %v450_v6 = vand.u32 2147483648, %v1314_v43  ;;  %v437_v47 = vsel %vm1356_vm9, %v436_v28, %v432_v32  ;;  %v447_v43 = vsel %vm1383_vm13, %v1328_v55, %v443_v62  ;;  %vm1405_vm15 = vmor %vm459_vm11, %vm460_vm12 }
 0x23c   :  { %vm1409_vm8 = vcmp.eq.f32.partialorder %v463_v35, 8.507059e+37  ;;  %v472_v5 = vmul.f32 %v1337_v8, %v471_v37  ;;  %v480_v55 = vand.u32 2147483648, %v1321_v59  ;;  %v438_v7 = vmul.f32 %v1212_v3, %v437_v47 }
 0x23d   :  { %651 = vperm.xlu1 %918, %v423_v24   ;;  %v451_v53 = vor.u32 1.1754944e-38, %v450_v6  ;;  %v462_v44 = vsel %vm1405_vm15, %v1331_v61, %v458_v42  ;;  %v502_v9 = vmul.f32 %v1339_v12, %v501_v46  ;;  %v508_v54 = vand.u32 2147483647, %v1325_v45 }
 0x23e   :  { %v1368_v56 = vpop.xlane.xlu2 %373  ;;  %vm504_vm9 = vweird.f32 %v1325_v45  ;;  %v1433_v3 = vor.u32 1.1754944e-38, %v510_v2  ;;  %vm475_vm11 = vweird.f32 %v1337_v8  ;;  %v467_v61 = vsel %vm1409_vm8, %v466_v16, %v462_v44 }
 0x23f   :  { %v1373_v20 = vperm.slane %v1368_v56, 0  ;;  %v1376_v41 = vperm.slane %v1368_v56, 1  ;;  %v1393_v50 = vperm.slane %v1368_v56, 4  ;;  %v1416_v57 = vperm.slane %v1368_v56, 6  ;;  %vm1466_vm13 = vmor %vm474_vm10, %vm475_vm11 }
 0x240   :  { %v1426_v13 = vperm.slane %v1368_v56, 7  ;;  %v452_v15 = vsel %vm1387_vm14, %v451_v53, %v447_v43  ;;  %vm505_vm12 = vweird.f32 %v1339_v12  ;;  %v1441_v63 = vadd.f32 %v1337_v8, %v472_v5 }
 0x241   :  { %967 = vrcp.f32 %v1373_v20  ;;  %v478_v18 = vand.u32 2147483647, %v1321_v59  ;;  %v453_v22 = vmul.f32 %v1217_v58, %v452_v15  ;;  %v1447_v24 = vadd.f32 %v1339_v12, %v502_v9  ;;  %vm1506_vm5 = vmor %vm504_vm9, %vm505_vm12 }
 0x242   :  { %969 = vrcp.f32 %v1376_v41  ;;  %v1449_v25 = vor.u32 1.1754944e-38, %v480_v55  ;;  %v1452_v0 = vperm.slane %v1368_v56, 2  ;;  %v485_v28 = vmul.f32 %v1423_v10, %v1343_v19 }
 0x243   :  { %971 = vrcp.f32 %v1393_v50  ;;  %v553_v58 = vand.u32 2147483647, %v1376_v41  ;;  %v555_v6 = vand.u32 2147483648, %v1376_v41  ;;  %v468_v32 = vmul.f32 %v1232_v17, %v467_v61 }
 0x244   :  { %973 = vrcp.f32 %v1416_v57  ;;  %v1471_v35 = vperm.slane %v1368_v56, 3  ;;  %v538_v42 = vand.u32 2147483647, %v1373_v20  ;;  %v477_v46 = vsel %vm1466_vm13, %v1337_v8, %v1441_v63 }
 0x245   :  { %656 = vperm.xlu1 %918, %v438_v7   ;;  %975 = vrcp.f32 %v1426_v13  ;;  %vm549_vm14 = vweird.f32 %v1376_v41  ;;  %vm534_vm15 = vweird.f32 %v1373_v20  ;;  %v540_v59 = vand.u32 2147483648, %v1373_v20 }
 0x246   :  { %vm1483_vm8 = vcmp.eq.f32.partialorder %v508_v54, 8.507059e+37  ;;  %vm1487_vm10 = vcmp.eq.f32.partialorder %v478_v18, 8.507059e+37  ;;  %977 = vrcp.f32 %v1452_v0  ;;  %vm1496_vm7 = vcmp.eq.f32.partialorder %v553_v58, 8.507059e+37 }
 0x247   :  { %v968_v21 = vpop.eup %967  ;;  %v556_v51 = vor.u32 1.1754944e-38, %v555_v6  ;;  %vm539_vm6 = vcmp.eq.f32.partialorder %v538_v42, 8.507059e+37  ;;  %v541_v15 = vor.u32 1.1754944e-38, %v540_v59  ;;  %v507_v16 = vsel %vm1506_vm5, %v1339_v12, %v1447_v24 }
 0x248   :  { %v970_v49 = vpop.eup %969  ;;  %v530_v27 = vmul.f32 %v968_v21, %v1373_v20  ;;  %vm535_vm11 = vweird.f32 %v968_v21  ;;  %v486_v63 = vsub.f32 1.0, %v485_v28  ;;  %979 = vrcp.f32 %v1471_v35 }
 0x249   :  { %v545_v31 = vmul.f32 %v970_v49, %v1376_v41  ;;  %v1478_v17 = vpop.eup %971  ;;  %vm550_vm13 = vweird.f32 %v970_v49  ;;  %vm536_vm4 = vmor %vm534_vm15, %vm535_vm11  ;;  %v482_v6 = vsel %vm1487_vm10, %v1449_v25, %v477_v46  ;;  %v1559_v25 = vperm.slane %v1368_v56, 5 }
 0x24a   :  { %v531_v37 = vsub.f32 1.0, %v530_v27  ;;  %v590_v53 = vmul.f32 %v1478_v17, %v1393_v50  ;;  %v1494_v1 = vpop.eup %973  ;;  %vm551_vm9 = vmor %vm549_vm14, %vm550_vm13  ;;  %vm595_vm12 = vweird.f32 %v1478_v17  ;;  %v487_v62 = vmul.f32 %v1423_v10, %v486_v63 }
 0x24b   :  { %v546_v47 = vsub.f32 1.0, %v545_v31  ;;  %v1500_v4 = vpop.eup %975  ;;  %v620_v44 = vmul.f32 %v1494_v1, %v1416_v57  ;;  %v483_v46 = vmul.f32 %v1226_v14, %v482_v6  ;;  %v645_v56 = vand.u32 2147483648, %v1426_v13 }
 0x24c   :  { %v532_v8 = vmul.f32 %v968_v21, %v531_v37  ;;  %v591_v55 = vsub.f32 1.0, %v590_v53  ;;  %v635_v45 = vmul.f32 %v1500_v4, %v1426_v13  ;;  %v1525_v31 = vpop.eup %977  ;;  %vm640_vm15 = vweird.f32 %v1500_v4 }
 0x24d   :  { %661 = vperm.xlu1 %918, %v453_v22   ;;  %v547_v43 = vmul.f32 %v970_v49, %v546_v47  ;;  %v621_v22 = vsub.f32 1.0, %v620_v44  ;;  %v560_v42 = vmul.f32 %v1525_v31, %v1452_v0  ;;  %v488_v59 = vadd.f32 %v1423_v10, %v487_v62 }
 0x24e   :  { %v533_v5 = vadd.f32 %v968_v21, %v532_v8  ;;  %v592_v61 = vmul.f32 %v1478_v17, %v591_v55  ;;  %v636_v27 = vsub.f32 1.0, %v635_v45  ;;  %v1566_v48 = vpop.eup %979  ;;  %vm639_vm10 = vweird.f32 %v1426_v13  ;;  %v985_v55 = vld [vmem:[#allocation2 + $0x40] sm:$0xff] }
 0x24f   :  { %v548_v9 = vadd.f32 %v970_v49, %v547_v43  ;;  %v622_v37 = vmul.f32 %v1494_v1, %v621_v22  ;;  %v561_v8 = vsub.f32 1.0, %v560_v42  ;;  %v643_v14 = vand.u32 2147483647, %v1426_v13 }
 0x250   :  { %v537_v54 = vsel %vm536_vm4, %v968_v21, %v533_v5  ;;  %v593_v41 = vadd.f32 %v1478_v17, %v592_v61  ;;  %v600_v21 = vand.u32 2147483648, %v1393_v50  ;;  %vm594_vm4 = vweird.f32 %v1393_v50 }
 0x251   :  { %v552_v20 = vsel %vm551_vm9, %v970_v49, %v548_v9  ;;  %v542_v18 = vsel %vm539_vm6, %v541_v15, %v537_v54  ;;  %v598_v49 = vand.u32 2147483647, %v1393_v50  ;;  %vm1538_vm5 = vmor %vm594_vm4, %vm595_vm12  ;;  %vm489_vm6 = vweird.f32 %v1343_v19 }
 0x252   :  { %v557_v12 = vsel %vm1496_vm7, %v556_v51, %v552_v20  ;;  %v543_v24 = vmul.f32 %v1259_v34, %v542_v18  ;;  %v512_v34 = vsel %vm1483_vm8, %v1433_v3, %v507_v16  ;;  %v597_v50 = vsel %vm1538_vm5, %v1478_v17, %v593_v41  ;;  %vm1588_vm9 = vmor %vm639_vm10, %vm640_vm15 }
 0x253   :  { %v558_v58 = vmul.f32 %v1253_v30, %v557_v12  ;;  %v637_v30 = vmul.f32 %v1500_v4, %v636_v27  ;;  %v601_v3 = vor.u32 1.1754944e-38, %v600_v21  ;;  %vm490_vm7 = vweird.f32 %v1423_v10 }
 0x254   :  { %691 = vperm.xlu2 %919, %v543_v24   ;;  %vm599_vm14 = vcmp.eq.f32.partialorder %v598_v49, 8.507059e+37  ;;  %v623_v60 = vadd.f32 %v1494_v1, %v622_v37  ;;  %vm625_vm8 = vweird.f32 %v1494_v1  ;;  %vm1578_vm11 = vmor %vm489_vm6, %vm490_vm7  ;;  %v495_v43 = vand.u32 2147483648, %v1343_v19 }
 0x255   :  { %696 = vperm.xlu0 %917, %v558_v58   ;;  %666 = vperm.xlu1 %918, %v468_v32   ;;  %v513_v32 = vmul.f32 %v1240_v23, %v512_v34  ;;  %v602_v47 = vsel %vm599_vm14, %v601_v3, %v597_v50  ;;  %v638_v17 = vadd.f32 %v1500_v4, %v637_v30  ;;  %v630_v23 = vand.u32 2147483648, %v1416_v57 }
 0x256   :  { %v603_v2 = vmul.f32 %v1265_v36, %v602_v47  ;;  %vm624_vm13 = vweird.f32 %v1416_v57  ;;  %v628_v51 = vand.u32 2147483647, %v1416_v57  ;;  %v493_v5 = vand.u32 2147483647, %v1343_v19 }
 0x257   :  { %981 = vrcp.f32 %v1559_v25  ;;  %vm1596_vm12 = vmor %vm624_vm13, %vm625_vm8  ;;  %v642_v36 = vsel %vm1588_vm9, %v1500_v4, %v638_v17  ;;  %v492_v57 = vsel %vm1578_vm11, %v1423_v10, %v488_v59  ;;  %v646_v7 = vor.u32 1.1754944e-38, %v645_v56 }
 0x258   :  { %v627_v19 = vsel %vm1596_vm12, %v1494_v1, %v623_v60  ;;  %v562_v44 = vmul.f32 %v1525_v31, %v561_v8  ;;  %v575_v9 = vmul.f32 %v1566_v48, %v1471_v35  ;;  %v631_v15 = vor.u32 1.1754944e-38, %v630_v23 }
 0x259   :  { %vm644_vm4 = vcmp.eq.f32.partialorder %v643_v14, 8.507059e+37  ;;  %v496_v16 = vor.u32 1.1754944e-38, %v495_v43  ;;  %vm629_vm5 = vcmp.eq.f32.partialorder %v628_v51, 8.507059e+37  ;;  %vm494_vm6 = vcmp.eq.f32.partialorder %v493_v5, 8.507059e+37 }
 0x25a   :  { %v647_v4 = vsel %vm644_vm4, %v646_v7, %v642_v36  ;;  %v1613_v10 = vperm.slane %v1309_v40, 7  ;;  %v632_v45 = vsel %vm629_vm5, %v631_v15, %v627_v19  ;;  %v563_v61 = vadd.f32 %v1525_v31, %v562_v44  ;;  %v986_v19 = vld [vmem:[#allocation2] sm:$0xff]  ;;  %v987_v44 = vld [vmem:[#allocation2 + $0x48] sm:$0xff] }
 0x25b   :  { %v497_v54 = vsel %vm494_vm6, %v496_v16, %v492_v57  ;;  %vm565_vm7 = vweird.f32 %v1525_v31  ;;  %v576_v1 = vsub.f32 1.0, %v575_v9  ;;  %v648_v20 = vmul.f32 %v1271_v39, %v647_v4 }
 0x25c   :  { %681 = vperm.xlu2 %919, %v513_v32   ;;  %v570_v18 = vand.u32 2147483648, %v1452_v0  ;;  %v633_v22 = vmul.f32 %v1274_v29, %v632_v45  ;;  %v498_v27 = vmul.f32 %v1246_v52, %v497_v54  ;;  %vm564_vm14 = vweird.f32 %v1452_v0 }
 0x25d   :  { %711 = vperm.xlu0 %917, %v603_v2   ;;  %671 = vperm.xlu1 %918, %v483_v46   ;;  %v982_v63 = vpop.eup %981  ;;  %v568_v40 = vand.u32 2147483647, %v1452_v0  ;;  %983 = vrcp.f32 %v1613_v10  ;;  %vm566_vm15 = vmor %vm564_vm14, %vm565_vm7  ;;  %v577_v39 = vmul.f32 %v1566_v48, %v576_v1  ;;  %vm580_vm10 = vweird.f32 %v1566_v48 }
 0x25e   :  { %v567_v12 = vsel %vm566_vm15, %v1525_v31, %v563_v61  ;;  %v605_v24 = vmul.f32 %v982_v63, %v1559_v25  ;;  %v571_v41 = vor.u32 1.1754944e-38, %v570_v18  ;;  %v585_v58 = vand.u32 2147483648, %v1471_v35 }
 0x25f   :  { %vm569_vm8 = vcmp.eq.f32.partialorder %v568_v40, 8.507059e+37  ;;  %v578_v52 = vadd.f32 %v1566_v48, %v577_v39  ;;  %vm579_vm11 = vweird.f32 %v1471_v35  ;;  %v583_v31 = vand.u32 2147483647, %v1471_v35  ;;  %v991_v39 = vld [vmem:[#allocation2 + $0x60] sm:$0xff] }
 0x260   :  { %v572_v29 = vsel %vm569_vm8, %v571_v41, %v567_v12  ;;  %v606_v0 = vsub.f32 1.0, %v605_v24  ;;  %vm581_vm13 = vmor %vm579_vm11, %vm580_vm10  ;;  %v586_v30 = vor.u32 1.1754944e-38, %v585_v58  ;;  %vm610_vm12 = vweird.f32 %v982_v63 }
 0x261   :  { %v573_v49 = vmul.f32 %v1243_v26, %v572_v29  ;;  %v582_v28 = vsel %vm581_vm13, %v1566_v48, %v578_v52  ;;  %vm584_vm9 = vcmp.eq.f32.partialorder %v583_v31, 8.507059e+37  ;;  %v615_v42 = vand.u32 2147483648, %v1559_v25  ;;  %v992_v29 = vld [vmem:[#allocation2 + $0x78] sm:$0xff]  ;;  %v994_v31 = vld [vmem:[#allocation2 + $0x20] sm:$0xff] }
 0x262   :  { %v607_v34 = vmul.f32 %v982_v63, %v606_v0  ;;  %v587_v62 = vsel %vm584_vm9, %v586_v30, %v582_v28  ;;  %vm609_vm4 = vweird.f32 %v1559_v25  ;;  %v613_v35 = vand.u32 2147483647, %v1559_v25  ;;  %v993_v0 = vld [vmem:[#allocation2 + $0x18] sm:$0xff] }
 0x263   :  { %v984_v21 = vpop.eup %983  ;;  %v588_v26 = vmul.f32 %v1268_v38, %v587_v62  ;;  %vm611_vm5 = vmor %vm609_vm4, %vm610_vm12  ;;  %v616_v46 = vor.u32 1.1754944e-38, %v615_v42  ;;  %v525_v59 = vand.u32 2147483648, %v1613_v10  ;;  %vm519_vm14 = vweird.f32 %v1613_v10  ;;  %v996_v62 = vld [vmem:[#allocation2 + $0x28] sm:$0xff] }
 0x264   :  { %726 = vperm.xlu2 %919, %v648_v20   ;;  %v515_v6 = vmul.f32 %v984_v21, %v1613_v10  ;;  %v608_v50 = vadd.f32 %v982_v63, %v607_v34  ;;  %vm614_vm6 = vcmp.eq.f32.partialorder %v613_v35, 8.507059e+37  ;;  %vm520_vm7 = vweird.f32 %v984_v21  ;;  %v989_v20 = vld [vmem:[#allocation2 + $0x50] sm:$0xff] }
 0x265   :  { %721 = vperm.xlu0 %917, %v633_v22   ;;  %676 = vperm.xlu1 %918, %v498_v27   ;;  %v523_v38 = vand.u32 2147483647, %v1613_v10  ;;  %vm521_vm15 = vmor %vm519_vm14, %vm520_vm7  ;;  %v526_v60 = vor.u32 1.1754944e-38, %v525_v59  ;;  %v990_v27 = vld [vmem:[#allocation2 + $0x10] sm:$0xff]  ;;  %vm1719_vm10 = vcmask 1044484   ;;  %vm1720_vm11 = vcmask 1045509  }
 0x266   :  { %v516_v37 = vsub.f32 1.0, %v515_v6  ;;  %v612_v3 = vsel %vm611_vm5, %v982_v63, %v608_v50  ;;  %v995_v34 = vld [vmem:[#allocation2 + $0x70] sm:$0xff]  ;;  %vm1721_vm13 = vcmask 1046534   ;;  %vm1722_vm9 = vcmask 1047559   ;;  %vm1724_vm12 = vmmov %vm1720_vm11 }
 0x267   :  { %v617_v47 = vsel %vm614_vm6, %v616_v46, %v612_v3  ;;  %vm524_vm8 = vcmp.eq.f32.partialorder %v523_v38, 8.507059e+37 }
 0x268   :  { %v517_v32 = vmul.f32 %v984_v21, %v516_v37  ;;  %v618_v48 = vmul.f32 %v1256_v33, %v617_v47 }
 0x26a   :  { %v518_v17 = vadd.f32 %v984_v21, %v517_v32 }
 0x26c   :  { %v522_v25 = vsel %vm521_vm15, %v984_v21, %v518_v17  ;;  %v997_v17 = vld [vmem:[#allocation2 + $0x30] sm:$0xff] }
 0x26d   :  { %701 = vperm.xlu1 %918, %v573_v49   ;;  %v527_v56 = vsel %vm524_vm8, %v526_v60, %v522_v25 }
 0x26e   :  { %v528_v8 = vmul.f32 %v1229_v11, %v527_v56  ;;  %v988_v11 = vld [vmem:[#allocation2 + $0x8] sm:$0xff] }
 0x275   :  { %706 = vperm.xlu1 %918, %v588_v26  }
 0x27d   :  { %716 = vperm.xlu1 %918, %v618_v48  }
 0x285   :  { %686 = vperm.xlu1 %918, %v528_v8  }
 0x2ae   :  { %v692_v2 = vpop.permute.xlu2 %691 }
 0x2af   :  { %v652_v23 = vpop.permute.xlu1 %651  ;;  %v737_v36 = vmul.f32 %v985_v55, %v692_v2 }
 0x2b0   :  { %v729_v7 = vmul.f32 %v986_v19, %v652_v23 }
 0x2b1   :  { %v801_v15 = vsel %vm78_vm0, %v737_v36, 0.0 }
 0x2b2   :  { %v802_v4 = vrot.slane %v801_v15, 4  ;;  %v745_v10 = vsel %vm78_vm0, %v729_v7, 0.0 }
 0x2b3   :  { %v746_v22 = vrot.slane %v745_v10, 4 }
 0x2b4   :  { %v803_v41 = vadd.f32 %v802_v4, %v801_v15 }
 0x2b5   :  { %v747_v37 = vadd.f32 %v746_v22, %v745_v10 }
 0x2b6   :  { %v682_v13 = vpop.permute.xlu2 %681  ;;  %v804_v3 = vrot.slane %v803_v41, 2 }
 0x2b7   :  { %v657_v14 = vpop.permute.xlu1 %656  ;;  %v735_v59 = vmul.f32 %v997_v17, %v682_v13 }
 0x2b8   :  { %v730_v16 = vmul.f32 %v988_v11, %v657_v14  ;;  %v998_v14 = vld [vmem:[#allocation2 + $0x58] sm:$0xff] }
 0x2ba   :  { %v752_v1 = vsel %vm78_vm0, %v730_v16, 0.0 }
 0x2bb   :  { %v753_v49 = vrot.slane %v752_v1, 4 }
 0x2bd   :  { %v754_v48 = vadd.f32 %v753_v49, %v752_v1 }
 0x2be   :  { %v727_v54 = vpop.permute.xlu2 %726 }
 0x2bf   :  { %v662_v53 = vpop.permute.xlu1 %661  ;;  %v744_v52 = vmul.f32 %v992_v29, %v727_v54 }
 0x2c0   :  { %v731_v40 = vmul.f32 %v990_v27, %v662_v53 }
 0x2c1   :  { %v850_v32 = vsel %vm78_vm0, %v744_v52, 0.0 }
 0x2c2   :  { %v759_v42 = vsel %vm78_vm0, %v731_v40, 0.0  ;;  %v851_v2 = vrot.slane %v850_v32, 4 }
 0x2c3   :  { %v760_v56 = vrot.slane %v759_v42, 4 }
 0x2c4   :  { %v852_v16 = vadd.f32 %v851_v2, %v850_v32  ;;  %v1000_v2 = vld [vmem:[#allocation2 + $0x38] sm:$0xff] }
 0x2c5   :  { %v761_v15 = vadd.f32 %v760_v56, %v759_v42 }
 0x2c6   :  { %v853_v52 = vrot.slane %v852_v16, 2 }
 0x2c7   :  { %v667_v43 = vpop.permute.xlu1 %666  ;;  %v697_v51 = vpop.permute.xlu0 %696 }
 0x2c8   :  { %v738_v9 = vmul.f32 %v987_v44, %v697_v51  ;;  %v732_v21 = vmul.f32 %v993_v0, %v667_v43  ;;  %v748_v43 = vrot.slane %v747_v37, 2  ;;  %v787_v44 = vsel %vm78_vm0, %v735_v59, 0.0 }
 0x2ca   :  { %v808_v45 = vsel %vm78_vm0, %v738_v9, 0.0  ;;  %v766_v46 = vsel %vm78_vm0, %v732_v21, 0.0  ;;  %v755_v9 = vrot.slane %v754_v48, 2  ;;  %v749_v54 = vadd.f32 %v748_v43, %v747_v37 }
 0x2cb   :  { %v809_v12 = vrot.slane %v808_v45, 4 }
 0x2cc   :  { %v750_v37 = vrot.slane %v749_v54, 1 }
 0x2cd   :  { %v810_v26 = vadd.f32 %v809_v12, %v808_v45  ;;  %v756_v12 = vadd.f32 %v755_v9, %v754_v48 }
 0x2cf   :  { %v672_v33 = vpop.permute.xlu1 %671  ;;  %v712_v5 = vpop.permute.xlu0 %711  ;;  %v811_v51 = vrot.slane %v810_v26, 2  ;;  %v757_v42 = vrot.slane %v756_v12, 1 }
 0x2d0   :  { %v741_v24 = vmul.f32 %v991_v39, %v712_v5  ;;  %v733_v28 = vmul.f32 %v994_v31, %v672_v33  ;;  %v767_v33 = vrot.slane %v766_v46, 4  ;;  %v762_v39 = vrot.slane %v761_v15, 2 }
 0x2d1   :  { %v812_v4 = vadd.f32 %v811_v51, %v810_v26 }
 0x2d2   :  { %v829_v35 = vsel %vm78_vm0, %v741_v24, 0.0  ;;  %v773_v38 = vsel %vm78_vm0, %v733_v28, 0.0  ;;  %v768_v10 = vadd.f32 %v767_v33, %v766_v46  ;;  %v763_v26 = vadd.f32 %v762_v39, %v761_v15 }
 0x2d3   :  { %v830_v8 = vrot.slane %v829_v35, 4  ;;  %v774_v5 = vrot.slane %v773_v38, 4  ;;  %v813_v0 = vrot.slane %v812_v4, 1 }
 0x2d4   :  { %v769_v21 = vrot.slane %v768_v10, 2 }
 0x2d5   :  { %v831_v11 = vadd.f32 %v830_v8, %v829_v35  ;;  %v814_v32 = vadd.f32 %v813_v0, %v812_v4 }
 0x2d6   :  { %v770_v46 = vadd.f32 %v769_v21, %v768_v10 }
 0x2d7   :  { %v677_v57 = vpop.permute.xlu1 %676  ;;  %v722_v63 = vpop.permute.xlu0 %721  ;;  %v832_v24 = vrot.slane %v831_v11, 2 }
 0x2d8   :  { %v743_v6 = vmul.f32 %v995_v34, %v722_v63  ;;  %v734_v50 = vmul.f32 %v996_v62, %v677_v57  ;;  %v805_v57 = vadd.f32 %v804_v3, %v803_v41  ;;  %v999_v41 = vld [vmem:[#allocation2 + $0x68] sm:$0xff]  ;;  %v854_v3 = vadd.f32 %v853_v52, %v852_v16 }
 0x2d9   :  { %v833_v35 = vadd.f32 %v832_v24, %v831_v11  ;;  %v751_v16 = vadd.f32 %v750_v37, %v749_v54 }
 0x2da   :  { %v843_v25 = vsel %vm78_vm0, %v743_v6, 0.0  ;;  %v780_v23 = vsel %vm78_vm0, %v734_v50, 0.0  ;;  %v855_v33 = vrot.slane %v854_v3, 1 }
 0x2db   :  { %v844_v55 = vrot.slane %v843_v25, 4  ;;  %v781_v19 = vrot.slane %v780_v23, 4  ;;  %v834_v43 = vrot.slane %v833_v35, 1 }
 0x2dd   :  { %v845_v1 = vadd.f32 %v844_v55, %v843_v25  ;;  %v782_v22 = vadd.f32 %v781_v19, %v780_v23  ;;  %v771_v55 = vrot.slane %v770_v46, 1 }
 0x2df   :  { %v702_v61 = vpop.permute.xlu1 %701  ;;  %v846_v31 = vrot.slane %v845_v1, 2 }
 0x2e0   :  { %v739_v18 = vmul.f32 %v989_v20, %v702_v61  ;;  %v775_v61 = vadd.f32 %v774_v5, %v773_v38  ;;  %v806_v20 = vrot.slane %v805_v57, 1 }
 0x2e1   :  { %v847_v48 = vadd.f32 %v846_v31, %v845_v1 }
 0x2e2   :  { %v815_v58 = vsel %vm78_vm0, %v739_v18, 0.0  ;;  %v788_v18 = vrot.slane %v787_v44, 4  ;;  %v776_v49 = vrot.slane %v775_v61, 2  ;;  %v807_v17 = vadd.f32 %v806_v20, %v805_v57 }
 0x2e3   :  { %v816_v30 = vrot.slane %v815_v58, 4  ;;  %v848_v57 = vrot.slane %v847_v48, 1 }
 0x2e4   :  { %v789_v6 = vadd.f32 %v788_v18, %v787_v44  ;;  %v777_v59 = vadd.f32 %v776_v49, %v775_v61  ;;  %v880_v5 = vsel %vm161_vm1, %v814_v32, %v807_v17  ;;  %v772_v61 = vadd.f32 %v771_v55, %v770_v46 }
 0x2e5   :  { %v817_v47 = vadd.f32 %v816_v30, %v815_v58  ;;  %v783_v30 = vrot.slane %v782_v22, 2 }
 0x2e6   :  { %v790_v25 = vrot.slane %v789_v6, 2 }
 0x2e7   :  { %v707_v60 = vpop.permute.xlu1 %706  ;;  %v818_v36 = vrot.slane %v817_v47, 2 }
 0x2e8   :  { %v740_v53 = vmul.f32 %v998_v14, %v707_v60  ;;  %v784_v60 = vadd.f32 %v783_v30, %v782_v22  ;;  %v758_v14 = vadd.f32 %v757_v42, %v756_v12  ;;  %v791_v4 = vadd.f32 %v790_v25, %v789_v6 }
 0x2e9   :  { %v819_v63 = vadd.f32 %v818_v36, %v817_v47  ;;  %v849_v22 = vadd.f32 %v848_v57, %v847_v48 }
 0x2ea   :  { %v822_v13 = vsel %vm78_vm0, %v740_v53, 0.0  ;;  %v764_v53 = vrot.slane %v763_v26, 1  ;;  %v785_v44 = vrot.slane %v784_v60, 1  ;;  %v873_v20 = vsel %vm161_vm1, %v758_v14, %v751_v16  ;;  %vm1723_vm1 = vmmov %vm1719_vm10 }
 0x2eb   :  { %v823_v7 = vrot.slane %v822_v13, 4  ;;  %v820_v28 = vrot.slane %v819_v63, 1 }
 0x2ec   :  { %v765_v10 = vadd.f32 %v764_v53, %v763_v26  ;;  %v786_v12 = vadd.f32 %v785_v44, %v784_v60 }
 0x2ed   :  { %v824_v45 = vadd.f32 %v823_v7, %v822_v13  ;;  %v821_v38 = vadd.f32 %v820_v28, %v819_v63  ;;  %v778_v13 = vrot.slane %v777_v59, 1 }
 0x2ee   :  { %v874_v54 = vsel %vm163_vm2, %v765_v10, %v873_v20 }
 0x2ef   :  { %v825_v27 = vrot.slane %v824_v45, 2  ;;  %v717_v40 = vpop.permute.xlu1 %716  ;;  %v881_v19 = vsel %vm163_vm2, %v821_v38, %v880_v5  ;;  %v779_v18 = vadd.f32 %v778_v13, %v777_v59  ;;  %v875_v52 = vsel %vm165_vm3, %v772_v61, %v874_v54  ;;  %vm1725_vm2 = vmmov %vm1721_vm13 }
 0x2f0   :  { %v742_v29 = vmul.f32 %v999_v41, %v717_v40  ;;  %v856_v40 = vadd.f32 %v855_v33, %v854_v3  ;;  %v792_v41 = vrot.slane %v791_v4, 1 }
 0x2f1   :  { %v826_v58 = vadd.f32 %v825_v27, %v824_v45  ;;  %v835_v45 = vadd.f32 %v834_v43, %v833_v35 }
 0x2f2   :  { %v836_v34 = vsel %vm78_vm0, %v742_v29, 0.0  ;;  %v793_v28 = vadd.f32 %v792_v41, %v791_v4 }
 0x2f3   :  { %v827_v62 = vrot.slane %v826_v58, 1  ;;  %v837_v50 = vrot.slane %v836_v34, 4 }
 0x2f5   :  { %v838_v47 = vadd.f32 %v837_v50, %v836_v34  ;;  %v828_v56 = vadd.f32 %v827_v62, %v826_v58  ;;  %v876_v58 = vsel %vm1723_vm1, %v779_v18, %v875_v52 }
 0x2f6   :  { %v877_v49 = vsel %vm1724_vm12, %v786_v12, %v876_v58 }
 0x2f7   :  { %v839_v8 = vrot.slane %v838_v47, 2  ;;  %v687_v23 = vpop.permute.xlu1 %686  ;;  %v882_v9 = vsel %vm165_vm3, %v828_v56, %v881_v19  ;;  %v878_v6 = vsel %vm1725_vm2, %v793_v28, %v877_v49  ;;  %vm1726_vm3 = vmmov %vm1722_vm9 }
 0x2f8   :  { %v736_v51 = vmul.f32 %v1000_v2, %v687_v23  ;;  %v883_v27 = vsel %vm1719_vm10, %v835_v45, %v882_v9 }
 0x2f9   :  { %v840_v36 = vadd.f32 %v839_v8, %v838_v47 }
 0x2fa   :  { %v794_v7 = vsel %vm78_vm0, %v736_v51, 0.0 }
 0x2fb   :  { %v841_v15 = vrot.slane %v840_v36, 1  ;;  %v795_v11 = vrot.slane %v794_v7, 4 }
 0x2fd   :  { %v842_v1 = vadd.f32 %v841_v15, %v840_v36  ;;  %v796_v63 = vadd.f32 %v795_v11, %v794_v7 }
 0x2ff   :  { %v884_v39 = vsel %vm1720_vm11, %v842_v1, %v883_v27  ;;  %v797_v24 = vrot.slane %v796_v63, 2 }
 0x300   :  { %v885_v29 = vsel %vm1721_vm13, %v849_v22, %v884_v39 }
 0x301   :  { %v798_v0 = vadd.f32 %v797_v24, %v796_v63  ;;  %v886_v21 = vsel %vm1722_vm9, %v856_v40, %v885_v29 }
 0x302   :  { %890 = vst.msk [vmem:[#allocation7 + $0x8] sm:$0xff] %vm78_vm0, %v886_v21 }
 0x303   :  { %v799_v31 = vrot.slane %v798_v0, 1 }
 0x305   :  { %v800_v34 = vadd.f32 %v799_v31, %v798_v0 }
 0x307   :  { %v879_v30 = vsel %vm1726_vm3, %v800_v34, %v878_v6 }
 0x308   :  { %889 = vst.msk [vmem:[#allocation7] sm:$0xff] %vm78_vm0, %v879_v30 }
 0x309   :  { %903 = dma.vmem_to_hbm [thread:$0]  %s896_s1, 256, %s898_s23, [#allocation4], %s1080_s17, %s1080_s17, %s1081_s18  }
 0x30a   :  { %1077 = dma.done.wait [#allocation4], 256  }
 0x30b   :  { %1078 = vsyncadd [#allocation4], 4294967040 }
 0x30c   :  { %908 = vsyncpa [#allocation3], 1 }
 0x30d   :  { %909 = vsyncpa [#allocation6], 1 }
 0x30e   :  { %910 = vsyncpa [#allocation4], 1 }

</bundles_post_ra>
